<compile_context>
chip_gen: v5e
topology: v5e:2x2
jax: 0.10.0
libtpu: 0.0.40
codegen_flags: <defaults>
</compile_context>

<pallas_src>
import functools

import jax
import jax.numpy as jnp
import numpy as np
from jax.experimental import pallas as pl
from jax.experimental.pallas import tpu as pltpu


# --------------------------------------------------------------------------- #
# Kernel
# --------------------------------------------------------------------------- #
def _jitter_kernel(off_ref, x_ref, o_ref):
    """One (b_tile, c_tile, T) block: gather along time via roll + select."""
    off = off_ref[...]                      # (b_tile, 1, T) int32, shared over C
    x = x_ref[...]                          # (b_tile, c_tile, T), native dtype

    # x_prev[..., t] = x[..., t-1]; x_next[..., t] = x[..., t+1]
    # (static-shift rolls; wrap values are masked out by the boundary clamps
    #  already baked into `off`, so they are never selected)
    x_prev = jnp.roll(x, 1, axis=2)
    x_next = jnp.roll(x, -1, axis=2)

    o_ref[...] = jnp.where(off == -1, x_prev, jnp.where(off == 1, x_next, x))


# --------------------------------------------------------------------------- #
# Wrapper
# --------------------------------------------------------------------------- #
def _sample_offsets(key, p: float, B: int, T: int) -> jax.Array:
    """Categorical over {-1,0,+1} with probs [p/2, 1-p, p/2] + boundary clamps."""
    u = jax.random.uniform(key, (B, T), dtype=jnp.float32)
    off = jnp.where(u < 0.5 * p, -1,
                    jnp.where(u >= 1.0 - 0.5 * p, 1, 0)).astype(jnp.int32)
    off = off.at[:, 0].set(jnp.maximum(off[:, 0], 0))      # index[:, 0].clamp_(0, 1)
    off = off.at[:, -1].set(jnp.minimum(off[:, -1], 0))    # index[:, -1].clamp_(-1, 0)
    return off


def _generation_defaults():
    """(target_block_bytes, vmem_limit_bytes) tuned per TPU generation."""
    kind = ""
    try:
        kind = jax.devices()[0].device_kind.lower()
    except Exception:
        pass
    if "v7" in kind:    # 64 MiB physical VMEM; ~6x block live (2 in, 2 out, temps)
        return 6 << 20, 52 << 20
    if "v6" in kind:    # 128 MiB physical; 1.3-1.4 TB/s HBM -> bigger blocks pay off
        return 12 << 20, 96 << 20
    if "v5" in kind:    # 820 GB/s HBM; per-step overhead already <4% at 4 MiB
        return 4 << 20, 64 << 20
    return 4 << 20, 48 << 20   # unknown backend (incl. interpret): conservative


def jitter(x: jax.Array, *, p: float, seed: int = 0, key=None,
           training: bool = True,
           target_block_bytes: int | None = None,
           vmem_limit_bytes: int | None = None) -> jax.Array:
    """Pallas TPU implementation of Jitter.forward. x: (B, C, T)."""
    if (not training) or p == 0.0:
        return x

    B, C, T = x.shape
    itemsize = jnp.dtype(x.dtype).itemsize

    # ---- per-(b, t) offsets, shared across channels; computed once ----------
    if key is None:
        key = jax.random.PRNGKey(seed)
    off = _sample_offsets(key, p, B, T)[:, None, :]     # (B, 1, T) int32

    # ---- generation-aware DMA block sizing ----------------------------------
    gen_blk, gen_vmem = _generation_defaults()
    if target_block_bytes is None:
        target_block_bytes = gen_blk
    if vmem_limit_bytes is None:
        vmem_limit_bytes = gen_vmem

    # Dtype-aware sublane alignment: 8 for f32, 16 for bf16, 32 for int8/fp8.
    sub = max(8, 32 // itemsize)

    # Lane-dense blocks: full T extent; tile channels, fold batches.
    # TODO(synk): add a time-tiled (1-column halo) fallback for extremely long
    # T where even a single sublane-aligned channel row over-fills VMEM.
    row_bytes = T * itemsize
    max_c = max(1, target_block_bytes // row_bytes)
    if C <= max_c:
        c_tile = C                                       # full channel extent
    else:
        c_tile = min(C, max(sub, (max_c // sub) * sub))  # sublane-aligned tile
    blk_bytes = c_tile * row_bytes
    b_tile = int(max(1, min(B, target_block_bytes // max(1, blk_bytes))))

    # Keep >= 2 (ideally >= 4) grid steps so v7x's two TensorCores both work.
    n_c = pl.cdiv(C, c_tile)
    while b_tile > 1 and pl.cdiv(B, b_tile) * n_c < 4:
        b_tile = max(1, b_tile // 2)
    if pl.cdiv(B, b_tile) * pl.cdiv(C, c_tile) < 2:
        half = ((c_tile // 2) // sub) * sub
        if 0 < half < C:
            c_tile = half
    grid = (pl.cdiv(B, b_tile), pl.cdiv(C, c_tile))

    kernel = functools.partial(_jitter_kernel)
    return pl.pallas_call(
        kernel,
        out_shape=jax.ShapeDtypeStruct((B, C, T), x.dtype),
        grid=grid,
        in_specs=[
            # Offsets: indexed by batch block only -> every channel tile of the
            # same batch block sees identical offsets (channel coherence).
            pl.BlockSpec((b_tile, 1, T), lambda b, c: (b, 0, 0)),
            pl.BlockSpec((b_tile, c_tile, T), lambda b, c: (b, c, 0)),
        ],
        out_specs=pl.BlockSpec((b_tile, c_tile, T), lambda b, c: (b, c, 0)),
        compiler_params=pltpu.CompilerParams(
            dimension_semantics=("parallel", "parallel"),
            vmem_limit_bytes=vmem_limit_bytes,
        ),
        cost_estimate=pl.CostEstimate(
            flops=0,
            transcendentals=0,
            bytes_accessed=2 * B * C * T * itemsize + B * T * 4,
        ),
    )(off, x)


# --------------------------------------------------------------------------- #
# Pure-JAX reference (exact, uses the same offsets)
# --------------------------------------------------------------------------- #
def _jitter_reference(x: jax.Array, off: jax.Array) -> jax.Array:
    B, C, T = x.shape
    idx = off + jnp.arange(T, dtype=jnp.int32)[None, :]          # (B, T)
    idx = jnp.broadcast_to(idx[:, None, :], (B, C, T))
    return jnp.take_along_axis(x, idx, axis=2)


# --------------------------------------------------------------------------- #
# Demo / self-test
# --------------------------------------------------------------------------- #
if __name__ == "__main__":
    p = 0.5

    # Small demo: B=2, C=8, T=128 (lane-dense T, sublane-aligned C), f32.
    B, C, T = 2, 8, 128
    x = jax.random.normal(jax.random.PRNGKey(0), (B, C, T), dtype=jnp.float32)

    y = jax.block_until_ready(jitter(x, p=p, seed=0, training=True))
    assert y.shape == x.shape and y.dtype == x.dtype
    y_ref = _jitter_reference(x, _sample_offsets(jax.random.PRNGKey(0), p, B, T))
    assert np.array_equal(np.asarray(y), np.asarray(y_ref)), \
        "kernel output mismatch vs reference gather"

    # Eval / p==0 paths are identity.
    assert np.array_equal(np.asarray(jitter(x, p=0.0, seed=0, training=True)),
                          np.asarray(x))
    assert np.array_equal(np.asarray(jitter(x, p=p, seed=0, training=False)),
                          np.asarray(x))

    # Multi channel-tile / multi batch-block path (tiny block budget) — offsets
    # must stay coherent across channel tiles and match the reference exactly.
    x2 = jax.random.normal(jax.random.PRNGKey(1), (2, 16, 128), dtype=jnp.float32)
    y2 = jax.block_until_ready(
        jitter(x2, p=p, seed=3, training=True, target_block_bytes=4096))
    y2_ref = _jitter_reference(x2, _sample_offsets(jax.random.PRNGKey(3), p, 2, 128))
    assert np.array_equal(np.asarray(y2), np.asarray(y2_ref)), \
        "channel-tiled path mismatch vs reference gather"

    # bf16 path exercises dtype-aware sublane alignment.
    x3 = jax.random.normal(jax.random.PRNGKey(2), (2, 16, 128), dtype=jnp.bfloat16)
    y3 = jax.block_until_ready(jitter(x3, p=p, seed=7, training=True))
    y3_ref = _jitter_reference(x3, _sample_offsets(jax.random.PRNGKey(7), p, 2, 128))
    assert np.array_equal(np.asarray(y3), np.asarray(y3_ref)), \
        "bf16 path mismatch vs reference gather"

    print("KERNEL_OK")
</pallas_src>

<mosaic_0001>
module attributes {stable_mosaic.version = 11 : i64} {
  func.func @_jitter_kernel(%arg0: i32, %arg1: i32, %arg2: memref<1x1x128xi32, #tpu.memory_space<vmem>>, %arg3: memref<1x8x128xf32, #tpu.memory_space<vmem>>, %arg4: memref<1x8x128xf32, #tpu.memory_space<vmem>>) attributes {dimension_semantics = [#tpu.dimension_semantics<parallel>, #tpu.dimension_semantics<parallel>], iteration_bounds = array<i64: 2, 1>, scalar_prefetch = 0 : i64, scratch_operands = 0 : i64, tpu.core_type = #tpu.core_type<tc>, window_params = [{transform_indices = @transform_0, window_bounds = array<i64: 1, 1, 128>}, {transform_indices = @transform_1, window_bounds = array<i64: 1, 8, 128>}, {transform_indices = @transform_2, window_bounds = array<i64: 1, 8, 128>}]} {
    %c0 = arith.constant 0 : index
    %c0_0 = arith.constant 0 : index
    %c0_1 = arith.constant 0 : index
    %0 = vector.load %arg2[%c0, %c0_0, %c0_1] : memref<1x1x128xi32, #tpu.memory_space<vmem>>, vector<1x1x128xi32>
    %c0_2 = arith.constant 0 : index
    %c0_3 = arith.constant 0 : index
    %c0_4 = arith.constant 0 : index
    %1 = vector.load %arg3[%c0_2, %c0_3, %c0_4] : memref<1x8x128xf32, #tpu.memory_space<vmem>>, vector<1x8x128xf32>
    %2 = vector.extract_strided_slice %1 {offsets = [0, 0, 127], sizes = [1, 8, 1], strides = [1, 1, 1]} : vector<1x8x128xf32> to vector<1x8x1xf32>
    %3 = vector.extract_strided_slice %1 {offsets = [0, 0, 0], sizes = [1, 8, 127], strides = [1, 1, 1]} : vector<1x8x128xf32> to vector<1x8x127xf32>
    %4 = tpu.concatenate %2, %3 in 2 : vector<1x8x1xf32>, vector<1x8x127xf32> -> vector<1x8x128xf32>
    %5 = vector.extract_strided_slice %1 {offsets = [0, 0, 1], sizes = [1, 8, 127], strides = [1, 1, 1]} : vector<1x8x128xf32> to vector<1x8x127xf32>
    %6 = vector.extract_strided_slice %1 {offsets = [0, 0, 0], sizes = [1, 8, 1], strides = [1, 1, 1]} : vector<1x8x128xf32> to vector<1x8x1xf32>
    %7 = tpu.concatenate %5, %6 in 2 : vector<1x8x127xf32>, vector<1x8x1xf32> -> vector<1x8x128xf32>
    %c-1_i32 = arith.constant -1 : i32
    %8 = vector.broadcast %c-1_i32 : i32 to vector<1x1x128xi32>
    %9 = arith.cmpi eq, %0, %8 : vector<1x1x128xi32>
    %c1_i32 = arith.constant 1 : i32
    %10 = vector.broadcast %c1_i32 : i32 to vector<1x1x128xi32>
    %11 = arith.cmpi eq, %0, %10 : vector<1x1x128xi32>
    %12 = vector.shape_cast %11 : vector<1x1x128xi1> to vector<1x1x128xi1>
    %13 = vector.broadcast %12 : vector<1x1x128xi1> to vector<1x8x128xi1>
    %14 = arith.select %13, %7, %1 : vector<1x8x128xi1>, vector<1x8x128xf32>
    %15 = vector.shape_cast %9 : vector<1x1x128xi1> to vector<1x1x128xi1>
    %16 = vector.broadcast %15 : vector<1x1x128xi1> to vector<1x8x128xi1>
    %17 = arith.select %16, %4, %14 : vector<1x8x128xi1>, vector<1x8x128xf32>
    %c0_5 = arith.constant 0 : index
    %c0_6 = arith.constant 0 : index
    %c0_7 = arith.constant 0 : index
    %18 = vector.load %arg4[%c0_5, %c0_6, %c0_7] : memref<1x8x128xf32, #tpu.memory_space<vmem>>, vector<1x8x128xf32>
    tpu.vector_store %arg4[%c0_5, %c0_6, %c0_7], %17 {strides = array<i32>} : memref<1x8x128xf32, #tpu.memory_space<vmem>>, vector<1x8x128xf32>,
    return
  }
  func.func @transform_0(%arg0: i32, %arg1: i32) -> (i32, i32, i32) {
    %c0_i32 = arith.constant 0 : i32
    %c0_i32_0 = arith.constant 0 : i32
    %c0_i32_1 = arith.constant 0 : i32
    return %arg0, %c0_i32, %c0_i32_0 : i32, i32, i32
  }
  func.func @transform_1(%arg0: i32, %arg1: i32) -> (i32, i32, i32) {
    %c0_i32 = arith.constant 0 : i32
    %c0_i32_0 = arith.constant 0 : i32
    return %arg0, %arg1, %c0_i32 : i32, i32, i32
  }
  func.func @transform_2(%arg0: i32, %arg1: i32) -> (i32, i32, i32) {
    %c0_i32 = arith.constant 0 : i32
    %c0_i32_0 = arith.constant 0 : i32
    return %arg0, %arg1, %c0_i32 : i32, i32, i32
  }
}

</mosaic_0001>

<bundles_post_ra>
// kernel: tpu_custom_call.1
= control target key start
LH: loop header
LB: loop body
LE: loop exit
PB: predicated region body
PF: predicated region fallthrough
CT: control target
= control target key end

     0   :  { %7 = vsyncpa [#allocation3], 0  ;;  %s736_s0 = inlined_call_operand.hbm [shape: s32[2,1,128], index: 0, kind: input, shape index: {}]   ;;  %s737_s1 = inlined_call_operand.hbm [shape: f32[2,8,128], index: 1, kind: input, shape index: {}]   ;;  %s738_s2 = inlined_call_operand.hbm [shape: f32[2,8,128], index: 2, kind: output, shape index: {}]  }
   0x1   :  { %9 = vsyncpa [#allocation3 + $0x1], 0 }
   0x2   :  { %10 = vsyncpa [#allocation6], 0 }
   0x3   :  { %12 = vsyncpa [#allocation6 + $0x1], 0 }
   0x4   :  { %13 = vsyncpa [#allocation4], 0 }
   0x5   :  { %15 = vsyncpa [#allocation4 + $0x1], 0  ;;  %s598_s9 = smov 0   ;;  %s600_s10 = smov 0  }
   0x6   :  { %s602_s11 = smov 0   ;;  %s604_s12 = smov 0  }
   0x7   :  { %s606_s13 = smov 0   ;;  %s608_s14 = smov 0  }
   0x8 LB: > { %s349_s15 = sadd.s32 4294967295, %s578_s14   ;;  %s350_s16 = sadd.s32 4294967294, %s578_s14   ;;  %s578_s14 = sphi %s608_s14, %s21_s14   ;;  %s574_s13 = sphi %s606_s13, %s748_s13   ;;  %s570_s12 = sphi %s604_s12, %s747_s12   ;;  %s566_s11 = sphi %s602_s11, %s746_s11   ;;  %s562_s10 = sphi %s600_s10, %s745_s10   ;;  %s558_s9 = sphi %s598_s9, %s744_s9  }
   0x9   : > { %s33_s17 = sadd.s32 1, %s574_s13  ;;  %s40_s18 = sadd.s32 1, %s566_s11 }
   0xa   : > { %p35_p0 = scmp.ge.s32.totalorder %s33_s17, 2  ;;  %p47_p1 = scmp.ne.s32.totalorder %s566_s11, %s562_s10 }
   0xb   : > { %p48_p2 = scmp.eq.s32.totalorder %s578_s14, 0  ;;  %p53_p3 = scmp.ne.s32.totalorder %s562_s10, %s558_s9 }
   0xc   : > { %s750_s17 = smov (%p35_p0, %s33_s17), 0  ;;  %p54_p5 = scmp.eq.s32.totalorder %s349_s15, 0 }
   0xd   : > { %p639_p4 = por %p48_p2, %p47_p1  ;;  %s37_s20 = ssub.s32 %s574_s13, %s750_s17 }
   0xe   : > { %p107_p6 = scmp.eq.s32.totalorder %s349_s15, 1  ;;  %p38_p7 = scmp.eq.s32.totalorder %s37_s20, 0 }
   0xf   : > { %p645_p8 = por %p54_p5, %p53_p3  ;;  %p113_p10 = scmp.eq.s32.totalorder %s350_s16, 1 }
  0x10   : > { %p649_p9 = por %p107_p6, %p47_p1  ;;  %p352_p12 = scmp.ge.s32.totalorder %s578_s14, 2 }
  0x11   : > { %s654_s23 = scalar_select %p38_p7, %s566_s11, %s40_s18  }
  0x12   : > { %p656_p11 = por %p113_p10, %p53_p3  ;;  %p379_p13 = scmp.lt.s32.totalorder %s578_s14, 2 }
  0x13   : > { %s133_s25 = sand.u32 1, %s566_s11   ;;  %s139_s28 = scalar_lea.hbm %s736_s0, %s574_s13 }
  0x14   : > { %s136_s29 = scalar_lea.vmem [#allocation2], %s133_s25  ;;  %s141_s3 = sshll.u32 %s139_s28, 4  ;;  %s142_s3 = int_to_ptr.hbm [resolvable:$true] %s141_s3 }
  0x15   : > { %s143_s30 = sshll.u32 %s136_s29, 4  ;;  %p669_p0 = pnand %p379_p13, %p639_p4  ;;  %s144_s30 = int_to_ptr.vmem [resolvable:$true] %s143_s30 }
  0x16   : > { %p355_p1 = scmp.ge.s32.totalorder %s578_s14, 1  ;;  %p168_p2 = scmp.lt.s32.totalorder %s578_s14, 3 }
  0x17   : > { %s134_s5 = scalar_lea.sflag [#allocation3], %s133_s25  ;;  %s353_s6 = sshll.u32 %s133_s25, 3 }
  0x18   : > { %371 = dma.hbm_to_vmem [thread:$0]  (!%p669_p0), %s142_s3, 16, %s144_s30, %s134_s5  }
  0x19   : > { %p169_p3 = pnand %p355_p1, %p168_p2  ;;  %s354_s7 = sshll.u32 %s574_s13, 3 }
  0x1a   : > { %s159_s16 = scalar_lea.hbm %s737_s1, %s354_s7  ;;  %s154_s18 = scalar_lea.vmem [#allocation5], %s353_s6 }
  0x1b   : > { %s163_s19 = sshll.u32 %s154_s18, 4  ;;  %s161_s20 = sshll.u32 %s159_s16, 4  ;;  %s164_s19 = int_to_ptr.vmem [resolvable:$true] %s163_s19  ;;  %s162_s20 = int_to_ptr.hbm [resolvable:$true] %s161_s20 }
  0x1c   : > { %s151_s26 = scalar_lea.sflag [#allocation6], %s133_s25  ;;  %172 = sbr.rel (%p169_p3) target bundleno = 165 (0xa5), region = 28 }
  0x1d   : > { %374 = dma.hbm_to_vmem [thread:$0]  (!%p669_p0), %s162_s20, 128, %s164_s19, %s151_s26  }
  0x1e   : > { %s684_s27 = sand.u32 (!%p169_p3), 1, %s562_s10  }
  0x1f   : > { %s175_s28 = scalar_lea.sflag (!%p169_p3), [#allocation3], %s684_s27  ;;  %s177_s29 = scalar_lea.vmem (!%p169_p3), [#allocation2], %s684_s27 }
  0x21   : > { %545 = dma.done.wait (%p645_p8), %s175_s28, 16  }
  0x22   : > { %547 = vsyncadd (%p645_p8), %s175_s28, 4294967280  ;;  %s356_s25 = sshll.u32 %s684_s27, 3  ;;  %s184_s30 = scalar_lea.sflag [#allocation6], %s684_s27 }
  0x23   : > { %s187_s3 = scalar_lea.vmem [#allocation5], %s356_s25 }
  0x24   : > { %549 = dma.done.wait (%p645_p8), %s184_s30, 128  }
  0x25   : > { %551 = vsyncadd (%p645_p8), %s184_s30, 4294967168  ;;  %v214_v0 = vld [vmem:[%s187_s3] sm:$0xff]  ;;  %s580_s4 = smov 127   ;;  %s581_s5 = smov 1   ;;  %v213_v1 = vld [vmem:[%s177_s29] sm:$0x1] }
  0x26   : > { %219 = vrot.lane.b32.xlu0 %v214_v0, %s580_s4  ;;  %vm223_vm0 = vcmp.eq.s32.totalorder %v213_v1, 1  ;;  %vm222_vm1 = vcmp.eq.s32.totalorder %v213_v1, 4294967295  ;;  %v582_v2 = vmov 0   ;;  %s359_s6 = sshll.u32 %s570_s12, 3  ;;  %s212_s15 = scalar_lea.vmem [#allocation7], %s356_s25 }
  0x27   : > { %v224_v3 = vsel %vm223_vm0, 1, %v582_v2  ;;  %v228_v4 = vsel %vm222_vm1, 1, %v582_v2  ;;  %s245_s8 = scalar_lea.hbm %s738_s2, %s359_s6  ;;  %s247_s16 = sshll.u32 %s212_s15, 4  ;;  %s248_s16 = int_to_ptr.vmem [resolvable:$true] %s247_s16 }
  0x28   : > { %v225_v6 = vperm.slane %v224_v3, 0  ;;  %v229_v7 = vperm.slane %v228_v4, 0  ;;  %s249_s18 = sshll.u32 %s245_s8, 4  ;;  %s234_s12 = scalar_lea.sflag [#allocation4], %s684_s27  ;;  %s250_s18 = int_to_ptr.hbm [resolvable:$true] %s249_s18 }
  0x29   : > { %s506_s19 = sshra.s32 %s250_s18, 4  ;;  %s512_s29 = scalar_lea.hbm %s738_s2, 16  ;;  %s507_s19 = int_to_ptr.hbm [resolvable:$true] %s506_s19 }
  0x2a   : > { %vm226_vm2 = vcmp.eq.s32.totalorder %v225_v6, 1  ;;  %vm230_vm3 = vcmp.eq.s32.totalorder %v229_v7, 1  ;;  %s508_s20 = scalar_lea.hbm %s507_s19, 8  ;;  %p513_p7 = scmp.lt.s32.totalorder %s507_s19, %s738_s2 }
  0x2b   : > { %p509_p4 = scmp.ne.s32.totalorder %s507_s19, %s508_s20  ;;  %p514_p8 = scmp.lt.s32.totalorder %s512_s29, %s508_s20 }
  0x2d   : > { %p510_p5 = pnand %p509_p4, %p649_p9  ;;  %p515_p10 = por %p514_p8, %p513_p7 }
  0x2e   : > { %216 = vrot.lane.b32.xlu0 %v214_v0, %s581_s5 }
  0x2f   : > { %p511_p6 = pneg %p510_p5 }
  0x31   : > { %p516_p13 = pnand %p515_p10, %p511_p6 }
  0x98   : > { %v220_v5 = vpop.permute.xlu0 %219 }
  0x99   : > { %v227_v8 = vsel %vm226_vm2, %v220_v5, %v214_v0 }
  0xa0   : > { %v217_v9 = vpop.permute.xlu0 %216 }
  0xa1   : > { %v231_v10 = vsel %vm230_vm3, %v217_v9, %v227_v8 }
  0xa2   : > { %232 = vst [vmem:[%s212_s15] sm:$0xff] %v231_v10 }
  0xa3   : > { %519 = shalt.err (!%p516_p13)
}
  0xa4   : > { %366 = dma.vmem_to_hbm [thread:$0]  (%p649_p9), %s248_s16, 128, %s250_s18, %s234_s12  }
  0xa5 PF: > { %s261_s27 = sand.u32 1, %s558_s9   ;;  %p376_p0 = pnand %p352_p12, %p656_p11 }
  0xa6   : > { %s262_s3 = scalar_lea.sflag [#allocation4], %s261_s27 }
  0xa7   : > { %p377_p1 = pneg %p376_p0 }
  0xa9   : > { %553 = dma.done.wait (%p377_p1), %s262_s3, 128  }
  0xaa   : > { %555 = vsyncadd (%p377_p1), %s262_s3, 4294967168  ;;  %s21_s14 = sadd.s32 1, %s578_s14   ;;  %s744_s9 = smov %s562_s10 }
  0xab   : > { %p18_p2 = scmp.ge.s32.totalorder %s21_s14, 4   ;;  %s745_s10 = smov %s566_s11 }
  0xac   : > { %s746_s11 = smov %s654_s23  ;;  %s747_s12 = smov %s574_s13 }
  0xad   : > { %s748_s13 = smov %s750_s17  ;;  %20 = sbr.rel (!%p18_p2) target bundleno = 8 (0x8), region = 86 }
  0xb2   :  { %268 = vsyncpa [#allocation3], 1 }
  0xb3   :  { %270 = vsyncpa [#allocation3 + $0x1], 1 }
  0xb4   :  { %271 = vsyncpa [#allocation6], 1 }
  0xb5   :  { %273 = vsyncpa [#allocation6 + $0x1], 1 }
  0xb6   :  { %274 = vsyncpa [#allocation4], 1 }
  0xb7   :  { %276 = vsyncpa [#allocation4 + $0x1], 1 }

</bundles_post_ra>
